<compile_context>
chip_gen: v5e
topology: v5e:2x2
jax: 0.10.0
libtpu: 0.0.40
codegen_flags: <defaults>
</compile_context>

<pallas_src>
import functools

import jax
import jax.numpy as jnp
from jax.experimental import pallas as pl
from jax.experimental.pallas import tpu as pltpu


# ---------------------------------------------------------------------------
# Kernel
# ---------------------------------------------------------------------------
def se_kernel(x_ref, w1t_ref, w2t_ref, out_ref, *, spatial_axis):
    # x_ref: (TB, C, HW) if spatial_axis == 2, else (TB, HW, C)
    # w1t_ref: (C, C//r)   w2t_ref: (C//r, C)
    x = x_ref[...]                                   # native dtype, no full-tile cast
    inv_hw = 1.0 / x.shape[spatial_axis]

    # squeeze: global average pool (accumulate in f32, x itself stays native)
    y = jnp.sum(x, axis=spatial_axis, dtype=jnp.float32) * inv_hw        # (TB, C)

    # excitation: Linear -> ReLU -> Linear -> Sigmoid (bias-free), all in f32
    h = jnp.dot(y, w1t_ref[...], preferred_element_type=jnp.float32)     # (TB, C//r)
    h = jnp.maximum(h, 0.0)
    s = jnp.dot(h, w2t_ref[...], preferred_element_type=jnp.float32)     # (TB, C)
    s = jax.nn.sigmoid(s).astype(x.dtype)

    # out = x + x * scale, broadcast over the spatial axis, native dtype
    if spatial_axis == 2:                            # layout (TB, C, HW)
        out_ref[...] = x + x * s[:, :, None]
    else:                                            # layout (TB, HW, C)
        out_ref[...] = x + x * s[:, None, :]


# ---------------------------------------------------------------------------
# Wrapper
# ---------------------------------------------------------------------------
# VMEM budget for the double-buffered in+out tiles (2 bufs x (in + out)).
# 24 MiB is comfortable on v5e/v6e (128 MiB) and leaves headroom on v7x (64 MiB).
_TILE_VMEM_BUDGET = 24 * 1024 * 1024
_VMEM_LIMIT_BYTES = 40 * 1024 * 1024


def se_layer(x, w1, w2):
    """x: (B, C, H, W);  w1: (C//r, C);  w2: (C, C//r).  Returns (x + x*scale, x)."""
    b, c, h, w = x.shape
    hw = h * w
    hidden = w1.shape[0]

    # --- lane-axis choice: put a 128-aligned (or at least the larger) dim last
    hw_lane_ok = hw % 128 == 0
    c_lane_ok = c % 128 == 0
    if hw_lane_ok and not c_lane_ok:
        spatial_last = True
    elif c_lane_ok and not hw_lane_ok:
        spatial_last = False
    else:
        spatial_last = hw >= c

    if spatial_last:
        x_flat = x.reshape(b, c, hw)                 # (B, C, HW): HW on lanes
        spatial_axis = 2
    else:
        x_flat = x.transpose(0, 2, 3, 1).reshape(b, hw, c)   # (B, HW, C): C on lanes
        spatial_axis = 1

    # --- batch-tile size from the VMEM budget (in + out, double-buffered)
    per_elem_bytes = c * hw * jnp.dtype(x.dtype).itemsize
    tb = max(1, min(b, _TILE_VMEM_BUDGET // (4 * per_elem_bytes)))
    if b >= 4:
        # keep >= 2 grid steps so both v7x TensorCores get work and each pipelines
        tb = min(tb, pl.cdiv(b, 2))
    grid = (pl.cdiv(b, tb),)

    w1t = w1.T  # (C, C//r) : y @ w1.T
    w2t = w2.T  # (C//r, C) : h @ w2.T

    block = (tb,) + x_flat.shape[1:]

    out_flat = pl.pallas_call(
        functools.partial(se_kernel, spatial_axis=spatial_axis),
        out_shape=jax.ShapeDtypeStruct(x_flat.shape, x.dtype),
        grid=grid,
        in_specs=[
            pl.BlockSpec(block, lambda i: (i, 0, 0)),
            pl.BlockSpec((c, hidden), lambda i: (0, 0)),   # constant: not re-DMA'd
            pl.BlockSpec((hidden, c), lambda i: (0, 0)),   # constant: not re-DMA'd
        ],
        out_specs=pl.BlockSpec(block, lambda i: (i, 0, 0)),
        compiler_params=pltpu.CompilerParams(
            dimension_semantics=("parallel",),
            vmem_limit_bytes=_VMEM_LIMIT_BYTES,
        ),
    )(x_flat, w1t, w2t)

    if spatial_last:
        out = out_flat.reshape(b, c, h, w)
    else:
        out = out_flat.reshape(b, h, w, c).transpose(0, 3, 1, 2)

    # forward returns (x + x*y, x): second element is the untouched input.
    return out, x


# ---------------------------------------------------------------------------
# Pure-JAX reference
# ---------------------------------------------------------------------------
def se_layer_ref(x, w1, w2):
    y = jnp.mean(x.astype(jnp.float32), axis=(2, 3))          # (B, C)
    h = jnp.maximum(y @ w1.T, 0.0)
    s = jax.nn.sigmoid(h @ w2.T)
    out = x + x * s[:, :, None, None].astype(x.dtype)
    return out.astype(x.dtype), x


if __name__ == "__main__":
    B, C, H, W = 2, 32, 16, 16
    reduction = 16
    hidden = C // reduction                                   # 2

    key = jax.random.PRNGKey(0)
    kx, k1, k2 = jax.random.split(key, 3)
    x = jax.random.normal(kx, (B, C, H, W), dtype=jnp.float32)
    # deterministic synthetic weights (nn.Linear weight shapes: (out, in))
    w1 = 0.1 * jax.random.normal(k1, (hidden, C), dtype=jnp.float32)
    w2 = 0.1 * jax.random.normal(k2, (C, hidden), dtype=jnp.float32)

    out, x_passthrough = se_layer(x, w1, w2)
    jax.block_until_ready(out)
    jax.block_until_ready(x_passthrough)

    # sanity check against a pure-JAX reference
    ref_out, ref_x = se_layer_ref(x, w1, w2)
    assert jnp.allclose(out, ref_out, atol=1e-5, rtol=1e-5)
    assert jnp.allclose(x_passthrough, ref_x)

    print("KERNEL_OK")
</pallas_src>

<mosaic_0001>
module attributes {stable_mosaic.version = 11 : i64} {
  func.func @se_kernel(%arg0: i32, %arg1: memref<2x32x256xf32, #tpu.memory_space<vmem>>, %arg2: memref<32x2xf32, #tpu.memory_space<vmem>>, %arg3: memref<2x32xf32, #tpu.memory_space<vmem>>, %arg4: memref<2x32x256xf32, #tpu.memory_space<vmem>>) attributes {dimension_semantics = [#tpu.dimension_semantics<parallel>], iteration_bounds = array<i64: 1>, scalar_prefetch = 0 : i64, scratch_operands = 0 : i64, tpu.core_type = #tpu.core_type<tc>, window_params = [{transform_indices = @transform_0, window_bounds = array<i64: 2, 32, 256>}, {pipeline_mode = #tpu.pipeline_mode<synchronous>, transform_indices = @transform_1, window_bounds = array<i64: 32, 2>}, {pipeline_mode = #tpu.pipeline_mode<synchronous>, transform_indices = @transform_2, window_bounds = array<i64: 2, 32>}, {transform_indices = @transform_3, window_bounds = array<i64: 2, 32, 256>}]} {
    %c0 = arith.constant 0 : index
    %c0_0 = arith.constant 0 : index
    %c0_1 = arith.constant 0 : index
    %0 = vector.load %arg1[%c0, %c0_0, %c0_1] : memref<2x32x256xf32, #tpu.memory_space<vmem>>, vector<2x32x256xf32>
    %cst = arith.constant dense<0.000000e+00> : vector<2x32xf32>
    %1 = vector.multi_reduction <add>, %0, %cst [2] : vector<2x32x256xf32> to vector<2x32xf32>
    %cst_2 = arith.constant 3.906250e-03 : f32
    %2 = vector.broadcast %cst_2 : f32 to vector<2x32xf32>
    %3 = arith.mulf %1, %2 : vector<2x32xf32>
    %c0_3 = arith.constant 0 : index
    %c0_4 = arith.constant 0 : index
    %4 = vector.load %arg2[%c0_3, %c0_4] : memref<32x2xf32, #tpu.memory_space<vmem>>, vector<32x2xf32>
    %cst_5 = arith.constant dense<0.000000e+00> : vector<2x2xf32>
    %5 = tpu.matmul %3, %4, %cst_5 {dimension_numbers = #tpu.dot_dimension_numbers<[1], [0], [0], [1], [0, 0, 1, 1], [], []>} : vector<2x32xf32>, vector<32x2xf32>, vector<2x2xf32> -> vector<2x2xf32>
    %cst_6 = arith.constant 0.000000e+00 : f32
    %6 = vector.broadcast %cst_6 : f32 to vector<2x2xf32>
    %7 = arith.maximumf %5, %6 : vector<2x2xf32>
    %c0_7 = arith.constant 0 : index
    %c0_8 = arith.constant 0 : index
    %8 = vector.load %arg3[%c0_7, %c0_8] : memref<2x32xf32, #tpu.memory_space<vmem>>, vector<2x32xf32>
    %cst_9 = arith.constant dense<0.000000e+00> : vector<2x32xf32>
    %9 = tpu.matmul %7, %8, %cst_9 {dimension_numbers = #tpu.dot_dimension_numbers<[1], [0], [0], [1], [0, 0, 1, 1], [], []>} : vector<2x2xf32>, vector<2x32xf32>, vector<2x32xf32> -> vector<2x32xf32>
    %10 = arith.negf %9 : vector<2x32xf32>
    %11 = math.exp %10 : vector<2x32xf32>
    %cst_10 = arith.constant 1.000000e+00 : f32
    %12 = vector.broadcast %cst_10 : f32 to vector<2x32xf32>
    %13 = arith.addf %12, %11 : vector<2x32xf32>
    %14 = arith.divf %12, %13 : vector<2x32xf32>
    %15 = vector.shape_cast %14 : vector<2x32xf32> to vector<2x32x1xf32>
    %16 = vector.broadcast %15 : vector<2x32x1xf32> to vector<2x32x256xf32>
    %17 = arith.mulf %0, %16 : vector<2x32x256xf32>
    %18 = arith.addf %0, %17 : vector<2x32x256xf32>
    %c0_11 = arith.constant 0 : index
    %c0_12 = arith.constant 0 : index
    %c0_13 = arith.constant 0 : index
    %19 = vector.load %arg4[%c0_11, %c0_12, %c0_13] : memref<2x32x256xf32, #tpu.memory_space<vmem>>, vector<2x32x256xf32>
    tpu.vector_store %arg4[%c0_11, %c0_12, %c0_13], %18 {strides = array<i32>} : memref<2x32x256xf32, #tpu.memory_space<vmem>>, vector<2x32x256xf32>,
    return
  }
  func.func @transform_0(%arg0: i32) -> (i32, i32, i32) {
    %c0_i32 = arith.constant 0 : i32
    %c0_i32_0 = arith.constant 0 : i32
    %c0_i32_1 = arith.constant 0 : i32
    return %arg0, %c0_i32, %c0_i32_0 : i32, i32, i32
  }
  func.func @transform_1(%arg0: i32) -> (i32, i32) {
    %c0_i32 = arith.constant 0 : i32
    %c0_i32_0 = arith.constant 0 : i32
    %c0_i32_1 = arith.constant 0 : i32
    return %c0_i32, %c0_i32_0 : i32, i32
  }
  func.func @transform_2(%arg0: i32) -> (i32, i32) {
    %c0_i32 = arith.constant 0 : i32
    %c0_i32_0 = arith.constant 0 : i32
    %c0_i32_1 = arith.constant 0 : i32
    return %c0_i32, %c0_i32_0 : i32, i32
  }
  func.func @transform_3(%arg0: i32) -> (i32, i32, i32) {
    %c0_i32 = arith.constant 0 : i32
    %c0_i32_0 = arith.constant 0 : i32
    %c0_i32_1 = arith.constant 0 : i32
    return %arg0, %c0_i32, %c0_i32_0 : i32, i32, i32
  }
}

</mosaic_0001>

<bundles_post_ra>
// kernel: tpu_custom_call.1
= control target key start
LH: loop header
LB: loop body
LE: loop exit
PB: predicated region body
PF: predicated region fallthrough
CT: control target
= control target key end

     0   :  { %8 = vsyncpa [#allocation3], 0  ;;  %s508_s0 = inlined_call_operand.hbm [shape: f32[2,32,256], index: 0, kind: input, shape index: {}]   ;;  %s509_s1 = inlined_call_operand.vmem [shape: f32[32,2], index: 1, kind: input, shape index: {}]   ;;  %s510_s2 = inlined_call_operand.vmem [shape: f32[2,32], index: 2, kind: input, shape index: {}]   ;;  %s511_s3 = inlined_call_operand.hbm [shape: f32[2,32,256], index: 3, kind: output, shape index: {}]  }
   0x1   :  { %9 = vsyncpa [#allocation4], 0  ;;  %s14_s14 = sshll.u32 %s508_s0, 4  ;;  %s377_s15 = smov [#allocation2]   ;;  %s15_s14 = int_to_ptr.hbm [resolvable:$true] %s14_s14 }
   0x2   :  { %s16_s16 = sshll.u32 %s377_s15, 4  ;;  %s378_s17 = smov 256   ;;  %s17_s16 = int_to_ptr.vmem [resolvable:$true] %s16_s16 }
   0x3   :  { %s379_s18 = smov 16  }
   0x4   :  { %22 = dma.hbm_to_vmem [thread:$0]  %s15_s14, 2048, %s17_s16, [#allocation3], %s378_s17, %s378_s17, %s379_s18  }
   0x5   :  { %373 = dma.done.wait [#allocation3], 2048  }
   0x6   :  { %374 = vsyncadd [#allocation3], 4294965248  ;;  %v407_v0 = vld [vmem:[#allocation2 + $0x40] sm:$0xff]  ;;  %v409_v1 = vld [vmem:[#allocation2 + $0x48] sm:$0xff]  ;;  %v91_v31 = vlaneseq  ;;  %vm96_vm0 = vcmask 130112   ;;  %vm100_vm1 = vcmask 195712  }
   0x7   :  { %v411_v2 = vld [vmem:[#allocation2] sm:$0xff]  ;;  %v59_v3 = vadd.f32 %v409_v1, %v407_v0  ;;  %v415_v4 = vld [vmem:[#allocation2 + $0x8] sm:$0xff]  ;;  %v425_v9 = vld [vmem:[#allocation2 + $0x50] sm:$0xff]  ;;  %vm104_vm2 = vcmask 261312   ;;  %vm113_vm3 = vcmask 1041409   ;;  %vm115_vm4 = vcmask 261120  }
   0x8   :  { %v417_v5 = vld [vmem:[#allocation2 + $0x20] sm:$0xff]  ;;  %v419_v6 = vld [vmem:[#allocation2 + $0x28] sm:$0xff]  ;;  %v47_v7 = vadd.f32 %v415_v4, %v411_v2  ;;  %v427_v10 = vld [vmem:[#allocation2 + $0x58] sm:$0xff]  ;;  %v92_v32 = vand.u32 127, %v91_v31  ;;  %vm144_vm5 = vcmask 1041408   ;;  %vm140_vm6 = vcmask 15360  }
   0x9   :  { %v53_v8 = vadd.f32 %v419_v6, %v417_v5  ;;  %60 = vadd.xlane.f32.xlu1 %v59_v3  ;;  %v429_v11 = vld [vmem:[#allocation2 + $0x10] sm:$0xff]  ;;  %v431_v12 = vld [vmem:[#allocation2 + $0x18] sm:$0xff]  ;;  %v433_v13 = vld [vmem:[#allocation2 + $0x60] sm:$0xff]  ;;  %v62_v15 = vadd.f32 %v427_v10, %v425_v9  ;;  %s291_s30 = sshll.u32 %s511_s3, 4  ;;  %s292_s30 = int_to_ptr.hbm [resolvable:$true] %s291_s30 }
   0xa   :  { %48 = vadd.xlane.f32.xlu0 %v47_v7  ;;  %v435_v14 = vld [vmem:[#allocation2 + $0x68] sm:$0xff]  ;;  %v50_v16 = vadd.f32 %v431_v12, %v429_v11  ;;  %v443_v18 = vld [vmem:[#allocation2 + $0x70] sm:$0xff]  ;;  %v445_v19 = vld [vmem:[#allocation2 + $0x78] sm:$0xff]  ;;  %v94_v34 = vadd.s32 4294967288, %v92_v32  ;;  %v98_v43 = vadd.s32 4294967280, %v92_v32  ;;  %v102_v47 = vadd.s32 4294967272, %v92_v32 }
   0xb   :  { %54 = vadd.xlane.f32.xlu2 %v53_v8  ;;  %v65_v17 = vadd.f32 %v435_v14, %v433_v13  ;;  %v447_v20 = vld [vmem:[#allocation2 + $0x30] sm:$0xff]  ;;  %v449_v21 = vld [vmem:[#allocation2 + $0x38] sm:$0xff]  ;;  %v68_v22 = vadd.f32 %v445_v19, %v443_v18  ;;  %v80_v26 = vld [vmem:[%s509_s1 + $0x8] sm:$0xff] }
   0xc   :  { %v56_v23 = vadd.f32 %v449_v21, %v447_v20  ;;  %v82_v24 = vld [vmem:[%s509_s1 + $0x18] sm:$0xff]  ;;  %v81_v25 = vld [vmem:[%s509_s1 + $0x10] sm:$0xff]  ;;  %v79_v27 = vld [vmem:[%s509_s1] sm:$0xff] }
   0xd   :  { %130 = vmatpush.msra.mxu0 %v82_v24  ;;  %v139_v3 = vld [vmem:[%s510_s2] sm:$0x3]  ;;  %s380_s2 = smov [#allocation5]  }
   0xe   :  { %305 = vmatpush.msk.msra.mxu1 %vm144_vm5, %v139_v3  ;;  %s289_s27 = sshll.u32 %s380_s2, 4  ;;  %s290_s27 = int_to_ptr.vmem [resolvable:$true] %s289_s27 }
   0xf   :  { %131 = vmatpush.msra.mxu0 %v81_v25 }
  0x11   :  { %63 = vadd.xlane.f32.xlu1 %v62_v15  ;;  %132 = vmatpush.msra.mxu0 %v80_v26  ;;  %v189_v15 = vshrl.u32 %v91_v31, 7 }
  0x12   :  { %51 = vadd.xlane.f32.xlu0 %v50_v16 }
  0x13   :  { %66 = vadd.xlane.f32.xlu2 %v65_v17  ;;  %133 = vmatpush.msra.mxu0 %v79_v27  ;;  %v202_v16 = vadd.s32 16, %v189_v15  ;;  %v196_v17 = vadd.s32 8, %v189_v15 }
  0x14   :  { %312 = vset.pattern.permute.xlu2 %v189_v15 }
  0x15   :  { %314 = vset.pattern.permute.xlu1 %v202_v16  ;;  %313 = vset.pattern.permute.xlu0 %v196_v17 }
  0x19   :  { %69 = vadd.xlane.f32.xlu1 %v68_v22 }
  0x1a   :  { %57 = vadd.xlane.f32.xlu0 %v56_v23 }
  0x7c   :  { %v61_v28 = vpop.xlane.xlu1 %60 }
  0x7d   :  { %v49_v29 = vpop.xlane.xlu0 %48  ;;  %v75_v39 = vmul.f32 0.00390625, %v61_v28 }
  0x7e   :  { %v55_v30 = vpop.xlane.xlu2 %54  ;;  %v71_v40 = vmul.f32 0.00390625, %v49_v29 }
  0x7f   :  { %v106_v45 = vperm.slane %v75_v39, %v92_v32  ;;  %v73_v46 = vmul.f32 0.00390625, %v55_v30 }
  0x80   :  { %v93_v48 = vperm.slane %v71_v40, %v92_v32 }
  0x81   :  { %v99_v56 = vperm.slane %v73_v46, %v98_v43 }
  0x84   :  { %v64_v33 = vpop.xlane.xlu1 %63 }
  0x85   :  { %v76_v35 = vmul.f32 0.00390625, %v64_v33  ;;  %v52_v36 = vpop.xlane.xlu0 %51 }
  0x86   :  { %v67_v37 = vpop.xlane.xlu2 %66  ;;  %v72_v38 = vmul.f32 0.00390625, %v52_v36 }
  0x87   :  { %v77_v41 = vmul.f32 0.00390625, %v67_v37  ;;  %v107_v42 = vperm.slane %v76_v35, %v94_v34  ;;  %v208_v37 = vadd.s32 24, %v189_v15 }
  0x88   :  { %v95_v44 = vperm.slane %v72_v38, %v94_v34 }
  0x89   :  { %v109_v49 = vperm.slane %v77_v41, %v98_v43  ;;  %v108_v51 = vsel %vm96_vm0, %v107_v42, %v106_v45 }
  0x8a   :  { %v97_v54 = vsel %vm96_vm0, %v95_v44, %v93_v48 }
  0x8b   :  { %v110_v59 = vsel %vm100_vm1, %v109_v49, %v108_v51  ;;  %v101_v60 = vsel %vm100_vm1, %v99_v56, %v97_v54 }
  0x8c   :  { %v70_v50 = vpop.xlane.xlu1 %69 }
  0x8d   :  { %v78_v52 = vmul.f32 0.00390625, %v70_v50  ;;  %v58_v53 = vpop.xlane.xlu0 %57 }
  0x8e   :  { %v74_v55 = vmul.f32 0.00390625, %v58_v53 }
  0x8f   :  { %v111_v57 = vperm.slane %v78_v52, %v102_v47 }
  0x90   :  { %v103_v58 = vperm.slane %v74_v55, %v102_v47 }
  0x91   :  { %v112_v61 = vsel %vm104_vm2, %v111_v57, %v110_v59 }
  0x92   :  { %v105_v62 = vsel %vm104_vm2, %v103_v58, %v101_v60 }
  0x93   :  { %v114_v63 = vsel %vm113_vm3, %v112_v61, %v105_v62 }
  0x94   :  { %304 = vmatmul.msk.f32.vlgmr.msra.gmra.mxu0 %vm115_vm4, %v114_v63 }
 0x111   :  { %v135_v7 = vpop.f32.mrf.mxu0 }
 0x112   :  { %v138_v8 = vmax.f32 %v135_v7, 0.0 }
 0x114   :  { %306 = vmatmul.msk.f32.vlgmr.msra.gmra.mxu1 %vm140_vm6, %v138_v8 }
 0x191   :  { %v165_v22 = vpop.f32.mrf.mxu1 }
 0x192   :  { %v307_v23 = vmul.f32 -1.442695, %v165_v22 }
 0x194   :  { %321 = vpow2.f32 %v307_v23 }
 0x19a   :  { %v322_v24 = vpop.eup %321 }
 0x19b   :  { %v171_v25 = vadd.f32 1.0, %v322_v24 }
 0x19d   :  { %323 = vrcp.f32 %v171_v25  ;;  %v183_v29 = vand.u32 2147483648, %v171_v25  ;;  %v181_v32 = vand.u32 2147483647, %v171_v25  ;;  %vm177_vm8 = vweird.f32 %v171_v25 }
 0x19f   :  { %v184_v31 = vor.u32 1.1754944e-38, %v183_v29  ;;  %vm182_vm10 = vcmp.eq.f32.partialorder %v181_v32, 8.507059e+37 }
 0x1a3   :  { %v324_v26 = vpop.eup %323 }
 0x1a4   :  { %v173_v27 = vmul.f32 %v324_v26, %v171_v25  ;;  %vm178_vm7 = vweird.f32 %v324_v26 }
 0x1a5   :  { %vm179_vm9 = vmor %vm177_vm8, %vm178_vm7 }
 0x1a6   :  { %v174_v28 = vsub.f32 1.0, %v173_v27 }
 0x1a8   :  { %v175_v30 = vmul.f32 %v324_v26, %v174_v28 }
 0x1aa   :  { %v176_v33 = vadd.f32 %v324_v26, %v175_v30 }
 0x1ac   :  { %v180_v34 = vsel %vm179_vm9, %v324_v26, %v176_v33 }
 0x1ad   :  { %v185_v35 = vsel %vm182_vm10, %v184_v31, %v180_v34 }
 0x1ae   :  { %v187_v36 = vperm.slane %v185_v35, 0  ;;  %v212_v38 = vperm.slane %v185_v35, 1 }
 0x1b0   :  { %204 = vperm.xlu1 %314, %v187_v36   ;;  %198 = vperm.xlu0 %313, %v187_v36  }
 0x1b1   :  { %192 = vperm.xlu2 %312, %v187_v36  }
 0x1b8   :  { %317 = vset.pattern.permute.xlu1 %v196_v17  ;;  %320 = vset.pattern.permute.xlu0 %v208_v37 }
 0x1b9   :  { %315 = vset.pattern.permute.xlu2 %v208_v37 }
 0x1c0   :  { %223 = vperm.xlu1 %317, %v212_v38  }
 0x1c1   :  { %210 = vperm.xlu2 %315, %v187_v36  }
 0x1c8   :  { %319 = vset.pattern.permute.xlu1 %v208_v37 }
 0x1c9   :  { %316 = vset.pattern.permute.xlu2 %v189_v15 }
 0x1d0   :  { %235 = vperm.xlu1 %319, %v212_v38  }
 0x1d1   :  { %217 = vperm.xlu2 %316, %v212_v38  }
 0x1d9   :  { %318 = vset.pattern.permute.xlu2 %v202_v16 }
 0x1e1   :  { %229 = vperm.xlu2 %318, %v212_v38  }
 0x20b   :  { %v193_v39 = vpop.permute.xlu2 %192 }
 0x20c   :  { %v237_v40 = vmul.f32 %v193_v39, %v411_v2  ;;  %v238_v41 = vmul.f32 %v193_v39, %v415_v4 }
 0x20e   :  { %v253_v42 = vadd.f32 %v237_v40, %v411_v2  ;;  %v254_v43 = vadd.f32 %v238_v41, %v415_v4 }
 0x210   :  { %269 = vst [vmem:[#allocation5] sm:$0xff] %v253_v42 }
 0x211   :  { %270 = vst [vmem:[#allocation5 + $0x8] sm:$0xff] %v254_v43 }
 0x21b   :  { %v211_v44 = vpop.permute.xlu2 %210 }
 0x21c   :  { %v243_v45 = vmul.f32 %v211_v44, %v447_v20  ;;  %v244_v46 = vmul.f32 %v211_v44, %v449_v21 }
 0x21e   :  { %v259_v47 = vadd.f32 %v243_v45, %v447_v20  ;;  %v260_v48 = vadd.f32 %v244_v46, %v449_v21 }
 0x220   :  { %275 = vst [vmem:[#allocation5 + $0x30] sm:$0xff] %v259_v47 }
 0x221   :  { %276 = vst [vmem:[#allocation5 + $0x38] sm:$0xff] %v260_v48 }
 0x222   :  { %v205_v49 = vpop.permute.xlu1 %204  ;;  %v199_v50 = vpop.permute.xlu0 %198 }
 0x223   :  { %v241_v51 = vmul.f32 %v205_v49, %v417_v5  ;;  %v242_v2 = vmul.f32 %v205_v49, %v419_v6  ;;  %v239_v4 = vmul.f32 %v199_v50, %v429_v11  ;;  %v240_v52 = vmul.f32 %v199_v50, %v431_v12 }
 0x225   :  { %v257_v53 = vadd.f32 %v241_v51, %v417_v5  ;;  %v258_v54 = vadd.f32 %v242_v2, %v419_v6  ;;  %v255_v20 = vadd.f32 %v239_v4, %v429_v11  ;;  %v256_v21 = vadd.f32 %v240_v52, %v431_v12 }
 0x227   :  { %273 = vst [vmem:[#allocation5 + $0x20] sm:$0xff] %v257_v53 }
 0x228   :  { %274 = vst [vmem:[#allocation5 + $0x28] sm:$0xff] %v258_v54 }
 0x229   :  { %271 = vst [vmem:[#allocation5 + $0x10] sm:$0xff] %v255_v20 }
 0x22a   :  { %272 = vst [vmem:[#allocation5 + $0x18] sm:$0xff] %v256_v21 }
 0x22b   :  { %v218_v55 = vpop.permute.xlu2 %217 }
 0x22c   :  { %v245_v56 = vmul.f32 %v218_v55, %v407_v0  ;;  %v246_v57 = vmul.f32 %v218_v55, %v409_v1 }
 0x22e   :  { %v261_v58 = vadd.f32 %v245_v56, %v407_v0  ;;  %v262_v59 = vadd.f32 %v246_v57, %v409_v1 }
 0x230   :  { %277 = vst [vmem:[#allocation5 + $0x40] sm:$0xff] %v261_v58 }
 0x231   :  { %278 = vst [vmem:[#allocation5 + $0x48] sm:$0xff] %v262_v59 }
 0x232   :  { %v224_v5 = vpop.permute.xlu1 %223 }
 0x233   :  { %v247_v6 = vmul.f32 %v224_v5, %v425_v9  ;;  %v248_v11 = vmul.f32 %v224_v5, %v427_v10 }
 0x235   :  { %v263_v12 = vadd.f32 %v247_v6, %v425_v9  ;;  %v264_v60 = vadd.f32 %v248_v11, %v427_v10 }
 0x237   :  { %279 = vst [vmem:[#allocation5 + $0x50] sm:$0xff] %v263_v12 }
 0x238   :  { %280 = vst [vmem:[#allocation5 + $0x58] sm:$0xff] %v264_v60 }
 0x23b   :  { %v230_v61 = vpop.permute.xlu2 %229 }
 0x23c   :  { %v249_v62 = vmul.f32 %v230_v61, %v433_v13  ;;  %v250_v0 = vmul.f32 %v230_v61, %v435_v14 }
 0x23e   :  { %v265_v1 = vadd.f32 %v249_v62, %v433_v13  ;;  %v266_v63 = vadd.f32 %v250_v0, %v435_v14 }
 0x240   :  { %281 = vst [vmem:[#allocation5 + $0x60] sm:$0xff] %v265_v1 }
 0x241   :  { %282 = vst [vmem:[#allocation5 + $0x68] sm:$0xff] %v266_v63 }
 0x242   :  { %v236_v3 = vpop.permute.xlu1 %235 }
 0x243   :  { %v251_v7 = vmul.f32 %v236_v3, %v443_v18  ;;  %v252_v9 = vmul.f32 %v236_v3, %v445_v19 }
 0x245   :  { %v267_v10 = vadd.f32 %v251_v7, %v443_v18  ;;  %v268_v8 = vadd.f32 %v252_v9, %v445_v19 }
 0x247   :  { %283 = vst [vmem:[#allocation5 + $0x70] sm:$0xff] %v267_v10 }
 0x248   :  { %284 = vst [vmem:[#allocation5 + $0x78] sm:$0xff] %v268_v8 }
 0x249   :  { %297 = dma.vmem_to_hbm [thread:$0]  %s290_s27, 2048, %s292_s30, [#allocation4], %s378_s17, %s378_s17, %s379_s18  }
 0x24a   :  { %375 = dma.done.wait [#allocation4], 2048  }
 0x24b   :  { %376 = vsyncadd [#allocation4], 4294965248 }
 0x24c   :  { %302 = vsyncpa [#allocation3], 1 }
 0x24d   :  { %303 = vsyncpa [#allocation4], 1 }

</bundles_post_ra>
